<compile_context>
chip_gen: v7x
topology: tpu7x:2x2x1
jax: 0.10.0
libtpu: 0.0.40
codegen_flags: <defaults>
</compile_context>

<pallas_src>
import jax
import jax.numpy as jnp
from jax.experimental import pallas as pl
from jax.experimental.pallas import tpu as pltpu

IN_FEATURES = 24 * 64   # 1536
OUT_FEATURES = 1
TILE_N = 2048           # rows per grid step (12 MiB/buffer f32, 24 MiB double-buffered)


def linear_relu_kernel(x_ref, w_ref, b_ref, o_ref):
    # x_ref: (tile_n, 1536) VMEM, native dtype (f32 or bf16)
    # w_ref: (1, 1536) f32 VMEM — constant block index, resident across the grid
    # b_ref: (1,) f32 SMEM scalar
    # o_ref: (tile_n, 1) f32 VMEM
    # Matvec on the VPU + lane reduce (XLU); fully hidden under the x DMA.
    x = x_ref[...].astype(jnp.float32)          # in-vreg upcast (free under DMA)
    y = jnp.sum(x * w_ref[...], axis=-1, keepdims=True) + b_ref[0]
    o_ref[...] = jnp.maximum(y, 0.0).astype(o_ref.dtype)


def _round_up(n, m):
    return pl.cdiv(n, m) * m


def simple_classifier_forward(x, w, b, *, tile_n=None):
    """relu(x.view(-1, 1536) @ w.T + b).

    x: any shape with total size a multiple of 1536 (e.g. (N, 24, 64)),
       f32 or bf16 (streamed at native width).
    w: (1, 1536) — same layout as PyTorch nn.Linear.weight (out, in).
    b: (1,)      — PyTorch nn.Linear.bias.
    Returns (N, 1) float32.
    """
    x_flat = x.reshape(-1, IN_FEATURES)
    if x_flat.dtype not in (jnp.float32, jnp.bfloat16):
        x_flat = x_flat.astype(jnp.float32)
    n = x_flat.shape[0]

    # Sublane multiple for the block's second-to-last dim: 8 for 4-byte, 16 for 2-byte.
    sublane = 8 if x_flat.dtype.itemsize == 4 else 16
    if tile_n is None:
        tile_n = min(TILE_N, _round_up(n, sublane))
    tile_n = _round_up(tile_n, sublane)

    grid = (pl.cdiv(n, tile_n),)

    itemsize = x_flat.dtype.itemsize
    cost = pl.CostEstimate(
        flops=2 * n * IN_FEATURES,
        transcendentals=0,
        bytes_accessed=n * IN_FEATURES * itemsize
        + IN_FEATURES * 4
        + n * OUT_FEATURES * 4,
    )

    out = pl.pallas_call(
        linear_relu_kernel,
        out_shape=jax.ShapeDtypeStruct((n, OUT_FEATURES), jnp.float32),
        grid_spec=pltpu.PrefetchScalarGridSpec(
            num_scalar_prefetch=0,
            grid=grid,
            in_specs=[
                # x: tiled along batch, pipelined/double-buffered; last tile partial.
                pl.BlockSpec((tile_n, IN_FEATURES), lambda i: (i, 0)),
                # w: constant block index -> stays resident across the grid.
                pl.BlockSpec((1, IN_FEATURES), lambda i: (0, 0)),
                # bias: single f32 scalar in SMEM.
                pl.BlockSpec(memory_space=pltpu.MemorySpace.SMEM),
            ],
            out_specs=pl.BlockSpec((tile_n, OUT_FEATURES), lambda i: (i, 0)),
        ),
        compiler_params=pltpu.CompilerParams(
            dimension_semantics=("parallel",),
            vmem_limit_bytes=48 * 1024 * 1024,
        ),
        cost_estimate=cost,
    )(x_flat, w.astype(jnp.float32), b.reshape(1).astype(jnp.float32))

    return out


def reference_forward(x, w, b):
    y = x.reshape(-1, IN_FEATURES).astype(jnp.float32) @ w.T.astype(jnp.float32) + b
    return jnp.maximum(y, 0.0)


if __name__ == "__main__":
    key = jax.random.PRNGKey(0)
    kx1, kx2, kw, kb = jax.random.split(key, 4)

    # PyTorch Linear init: U(-1/sqrt(in), 1/sqrt(in)); weight layout (out, in).
    bound = 1.0 / (IN_FEATURES ** 0.5)
    w = jax.random.uniform(kw, (OUT_FEATURES, IN_FEATURES), jnp.float32,
                           minval=-bound, maxval=bound)
    b = jax.random.uniform(kb, (OUT_FEATURES,), jnp.float32,
                           minval=-bound, maxval=bound)

    # 1) Tiny batch matching the module's forward: (8, 24, 64) f32.
    x_small = jax.random.normal(kx1, (8, 24, 64), jnp.float32)
    out_small = jax.block_until_ready(simple_classifier_forward(x_small, w, b))
    ref_small = reference_forward(x_small, w, b)
    assert out_small.shape == (8, 1)
    assert jnp.allclose(out_small, ref_small, atol=1e-4, rtol=1e-4)

    # 2) Ragged batch with a forced small tile: exercises the multi-tile
    #    pipelined path AND the partial last block (no jnp.pad copy).
    x_big = jax.random.normal(kx2, (1030, 24, 64), jnp.float32)
    out_big = jax.block_until_ready(
        simple_classifier_forward(x_big, w, b, tile_n=512))
    ref_big = reference_forward(x_big, w, b)
    assert out_big.shape == (1030, 1)
    assert jnp.allclose(out_big, ref_big, atol=1e-4, rtol=1e-4)

    # 3) bf16 activations streamed at native width, upcast in-kernel.
    x_bf16 = x_big.astype(jnp.bfloat16)
    out_bf16 = jax.block_until_ready(simple_classifier_forward(x_bf16, w, b))
    ref_bf16 = reference_forward(x_bf16, w, b)
    assert out_bf16.shape == (1030, 1)
    assert jnp.allclose(out_bf16, ref_bf16, atol=1e-4, rtol=1e-4)

    print("KERNEL_OK")
</pallas_src>

<mosaic_0001>
module attributes {stable_mosaic.version = 11 : i64} {
  func.func @linear_relu_kernel(%arg0: i32, %arg1: memref<8x1536xf32, #tpu.memory_space<vmem>>, %arg2: memref<1x1536xf32, #tpu.memory_space<vmem>>, %arg3: memref<1xf32, #tpu.memory_space<smem>>, %arg4: memref<8x1xf32, #tpu.memory_space<vmem>>) attributes {dimension_semantics = [#tpu.dimension_semantics<parallel>], iteration_bounds = array<i64: 1>, scalar_prefetch = 0 : i64, scratch_operands = 0 : i64, tpu.core_type = #tpu.core_type<tc>, window_params = [{transform_indices = @transform_0, window_bounds = array<i64: 8, 1536>}, {pipeline_mode = #tpu.pipeline_mode<synchronous>, transform_indices = @transform_1, window_bounds = array<i64: 1, 1536>}, {transform_indices = @transform_2, window_bounds = array<i64: 1>}, {transform_indices = @transform_3, window_bounds = array<i64: 8, 1>}]} {
    %c0 = arith.constant 0 : index
    %c0_0 = arith.constant 0 : index
    %0 = vector.load %arg1[%c0, %c0_0] : memref<8x1536xf32, #tpu.memory_space<vmem>>, vector<8x1536xf32>
    %c0_1 = arith.constant 0 : index
    %c0_2 = arith.constant 0 : index
    %1 = vector.load %arg2[%c0_1, %c0_2] : memref<1x1536xf32, #tpu.memory_space<vmem>>, vector<1x1536xf32>
    %2 = vector.broadcast %1 : vector<1x1536xf32> to vector<8x1536xf32>
    %3 = arith.mulf %0, %2 : vector<8x1536xf32>
    %cst = arith.constant dense<0.000000e+00> : vector<8xf32>
    %4 = vector.multi_reduction <add>, %3, %cst [1] : vector<8x1536xf32> to vector<8xf32>
    %5 = vector.shape_cast %4 : vector<8xf32> to vector<8x1xf32>
    %c0_3 = arith.constant 0 : index
    %6 = memref.load %arg3[%c0_3] : memref<1xf32, #tpu.memory_space<smem>>
    %7 = vector.broadcast %6 : f32 to vector<8x1xf32>
    %8 = arith.addf %5, %7 : vector<8x1xf32>
    %cst_4 = arith.constant 0.000000e+00 : f32
    %9 = vector.broadcast %cst_4 : f32 to vector<8x1xf32>
    %10 = arith.maximumf %8, %9 : vector<8x1xf32>
    %c0_5 = arith.constant 0 : index
    %c0_6 = arith.constant 0 : index
    %11 = vector.load %arg4[%c0_5, %c0_6] : memref<8x1xf32, #tpu.memory_space<vmem>>, vector<8x1xf32>
    tpu.vector_store %arg4[%c0_5, %c0_6], %10 {strides = array<i32>} : memref<8x1xf32, #tpu.memory_space<vmem>>, vector<8x1xf32>,
    return
  }
  func.func @transform_0(%arg0: i32) -> (i32, i32) {
    %c0_i32 = arith.constant 0 : i32
    %c0_i32_0 = arith.constant 0 : i32
    return %arg0, %c0_i32 : i32, i32
  }
  func.func @transform_1(%arg0: i32) -> (i32, i32) {
    %c0_i32 = arith.constant 0 : i32
    %c0_i32_0 = arith.constant 0 : i32
    %c0_i32_1 = arith.constant 0 : i32
    return %c0_i32, %c0_i32_0 : i32, i32
  }
  func.func @transform_2(%arg0: i32) -> i32 {
    %c0_i32 = arith.constant 0 : i32
    %c0_i32_0 = arith.constant 0 : i32
    return %c0_i32 : i32
  }
  func.func @transform_3(%arg0: i32) -> (i32, i32) {
    %c0_i32 = arith.constant 0 : i32
    %c0_i32_0 = arith.constant 0 : i32
    return %arg0, %c0_i32 : i32, i32
  }
}

</mosaic_0001>

<bundles_post_ra>
// kernel: tpu_custom_call.1
= control target key start
LH: loop header
LB: loop body
LE: loop exit
PB: predicated region body
PF: predicated region fallthrough
CT: control target
= control target key end

     0   :  { %9 = vsyncpa [#allocation4], 0  ;;  %s254_s0 = inlined_call_operand.hbm [shape: f32[8,1536], index: 0, kind: input, shape index: {}]   ;;  %s255_s1 = inlined_call_operand.hbm [shape: f32[1,1536], index: 1, kind: input, shape index: {}]   ;;  %s256_s2 = inlined_call_operand.<no memory space> [shape: f32[1], index: 2, kind: input, shape index: {}]   ;;  %s257_s3 = inlined_call_operand.vmem [shape: f32[8,1], index: 3, kind: output, shape index: {}]  }
   0x1   :  { %10 = vsyncpa [#allocation6], 0  ;;  %s202_s12 = smov [#allocation3]   ;;  %s203_s14 = smov [#allocation5]  }
   0x2   :  { %s17_s13 = sshll.u32 %s202_s12, 4  ;;  %s27_s15 = sshll.u32 %s203_s14, 4  ;;  %s18_s13 = int_to_ptr.vmem [resolvable:$true] %s17_s13  ;;  %s28_s15 = int_to_ptr.vmem [resolvable:$true] %s27_s15 }
   0x3   :  { %s154_s18 = scalar_lea.hbm %s254_s0, 1536 }
   0x4   :  { %p155_p0 = scmp.ne.s32.totalorder %s254_s0, %s154_s18  ;;  %p158_p1 = scmp.lt.u32.totalorder %s154_s18, %s254_s0 }
   0x6   :  { %p160_p2 = pnand %p158_p1, %p155_p0 }
   0x8   :  { %163 = shalt.err (!%p160_p2)
}
   0x9   :  { %s164_s23 = scalar_lea.vmem %s18_s13, 1536  ;;  %p169_p4 = scmp.lt.s32.totalorder %s18_s13, %s18_s13 }
   0xa   :  { %p165_p3 = scmp.ne.s32.totalorder %s18_s13, %s164_s23  ;;  %p170_p5 = scmp.lt.s32.totalorder %s164_s23, %s164_s23 }
   0xc   :  { %p171_p6 = por %p170_p5, %p169_p4 }
   0xe   :  { %p172_p7 = pnand %p171_p6, %p165_p3 }
  0x10   :  { %175 = shalt.err (!%p172_p7)
}
  0x11   :  { %20 = dma.hbm_to_vmem [thread:$0]  %s254_s0, 1536, %s18_s13, [#allocation4]  }
  0x12   :  { %s176_s28 = scalar_lea.hbm %s255_s1, 192 }
  0x13   :  { %p177_p8 = scmp.ne.s32.totalorder %s255_s1, %s176_s28  ;;  %p180_p9 = scmp.lt.u32.totalorder %s176_s28, %s255_s1 }
  0x15   :  { %p182_p10 = pnand %p180_p9, %p177_p8 }
  0x17   :  { %185 = shalt.err (!%p182_p10)
}
  0x18   :  { %s186_s6 = scalar_lea.vmem %s28_s15, 192  ;;  %p191_p12 = scmp.lt.s32.totalorder %s28_s15, %s28_s15 }
  0x19   :  { %p187_p11 = scmp.ne.s32.totalorder %s28_s15, %s186_s6  ;;  %p192_p13 = scmp.lt.s32.totalorder %s186_s6, %s186_s6 }
  0x1b   :  { %p193_p0 = por %p192_p13, %p191_p12 }
  0x1d   :  { %p194_p1 = pnand %p193_p0, %p187_p11 }
  0x1f   :  { %197 = shalt.err (!%p194_p1)
}
  0x20   :  { %30 = dma.hbm_to_vmem [thread:$0]  %s255_s1, 192, %s28_s15, [#allocation6]  }
  0x21   :  { %198 = dma.done.wait [#allocation4], 1536  }
  0x22   :  { %199 = vsyncadd [#allocation4], 4294965760 }
  0x23   :  { %200 = dma.done.wait [#allocation6], 192  }
  0x24   :  { %201 = vsyncadd [#allocation6], 4294967104  ;;  %v55_v0 = vlaneseq  ;;  %v51_v6 = vld [vmem:[#allocation5] sm:$0xff]  ;;  %v40_v8 = vld [vmem:[#allocation3 + $0x8] sm:$0xff]  ;;  %v141_v59 = vstv %s256_s2  ;;  %vm144_vm0 = vcmask 7168  }
  0x25   :  { %v39_v7 = vld [vmem:[#allocation3] sm:$0xff]  ;;  %v41_v13 = vld [vmem:[#allocation3 + $0x10] sm:$0xff]  ;;  %v42_v16 = vld [vmem:[#allocation3 + $0x18] sm:$0xff] }
  0x26   :  { %v56_v1 = vshrl.u32 %v55_v0, 7  ;;  %v43_v22 = vld [vmem:[#allocation3 + $0x20] sm:$0xff]  ;;  %v44_v27 = vld [vmem:[#allocation3 + $0x28] sm:$0xff]  ;;  %v45_v31 = vld [vmem:[#allocation3 + $0x30] sm:$0xff] }
  0x27   :  { %v52_v32 = vld [vmem:[#allocation5 + $0x8] sm:$0xf]  ;;  %v46_v36 = vld [vmem:[#allocation3 + $0x38] sm:$0xff]  ;;  %v47_v40 = vld [vmem:[#allocation3 + $0x40] sm:$0xff] }
  0x28   :  { %v57_v2 = vsub.s32 0, %v56_v1  ;;  %v61_v3 = vsub.s32 1, %v56_v1  ;;  %v65_v4 = vsub.s32 2, %v56_v1  ;;  %v69_v5 = vsub.s32 3, %v56_v1  ;;  %v48_v44 = vld [vmem:[#allocation3 + $0x48] sm:$0xff]  ;;  %v49_v48 = vld [vmem:[#allocation3 + $0x50] sm:$0xff] }
  0x29   :  { %v73_v12 = vsub.s32 4, %v56_v1  ;;  %v77_v15 = vsub.s32 5, %v56_v1  ;;  %v81_v20 = vsub.s32 6, %v56_v1  ;;  %v85_v24 = vsub.s32 7, %v56_v1  ;;  %v50_v52 = vld [vmem:[#allocation3 + $0x58] sm:$0xff] }
  0x2a   :  { %v58_v9 = vrot.slane %v51_v6, %v57_v2  ;;  %v62_v10 = vrot.slane %v51_v6, %v61_v3  ;;  %v66_v11 = vrot.slane %v51_v6, %v65_v4  ;;  %v70_v14 = vrot.slane %v51_v6, %v69_v5 }
  0x2b   :  { %v74_v19 = vrot.slane %v51_v6, %v73_v12  ;;  %v78_v23 = vrot.slane %v51_v6, %v77_v15  ;;  %v82_v28 = vrot.slane %v51_v6, %v81_v20  ;;  %v86_v33 = vrot.slane %v51_v6, %v85_v24 }
  0x2c   :  { %v115_v17 = vmul.f32 %v58_v9, %v39_v7  ;;  %v116_v18 = vmul.f32 %v62_v10, %v40_v8  ;;  %v117_v21 = vmul.f32 %v66_v11, %v41_v13  ;;  %v118_v25 = vmul.f32 %v70_v14, %v42_v16 }
  0x2d   :  { %v119_v29 = vmul.f32 %v74_v19, %v43_v22  ;;  %v120_v34 = vmul.f32 %v78_v23, %v44_v27  ;;  %v90_v37 = vrot.slane %v52_v32, %v57_v2  ;;  %v121_v38 = vmul.f32 %v82_v28, %v45_v31 }
  0x2e   :  { %v127_v26 = vadd.f32 %v116_v18, %v115_v17  ;;  %v94_v41 = vrot.slane %v52_v32, %v61_v3  ;;  %v122_v42 = vmul.f32 %v86_v33, %v46_v36  ;;  %v98_v45 = vrot.slane %v52_v32, %v65_v4 }
  0x2f   :  { %v123_v46 = vmul.f32 %v90_v37, %v47_v40  ;;  %v102_v49 = vrot.slane %v52_v32, %v69_v5 }
  0x30   :  { %v128_v30 = vadd.f32 %v127_v26, %v117_v21  ;;  %v124_v50 = vmul.f32 %v94_v41, %v48_v44  ;;  %v125_v53 = vmul.f32 %v98_v45, %v49_v48 }
  0x31   :  { %v126_v55 = vmul.f32 %v102_v49, %v50_v52 }
  0x32   :  { %v129_v35 = vadd.f32 %v128_v30, %v118_v25 }
  0x34   :  { %v130_v39 = vadd.f32 %v129_v35, %v119_v29 }
  0x36   :  { %v131_v43 = vadd.f32 %v130_v39, %v120_v34 }
  0x38   :  { %v132_v47 = vadd.f32 %v131_v43, %v121_v38 }
  0x3a   :  { %v133_v51 = vadd.f32 %v132_v47, %v122_v42 }
  0x3c   :  { %v134_v54 = vadd.f32 %v133_v51, %v123_v46 }
  0x3e   :  { %v135_v56 = vadd.f32 %v134_v54, %v124_v50 }
  0x40   :  { %v136_v57 = vadd.f32 %v135_v56, %v125_v53 }
  0x42   :  { %v137_v58 = vadd.f32 %v136_v57, %v126_v55 }
  0x44   :  { %138 = vadd.xlane.f32.xlu0 %v137_v58 }
  0xd1   :  { %v139_v60 = vpop.xlane.xlu0 %138 }
  0xd2   :  { %v142_v61 = vadd.f32 %v141_v59, %v139_v60 }
  0xd4   :  { %v143_v62 = vmax.f32 %v142_v61, 0.0 }
  0xd6   :  { %145 = vst.msk [vmem:[%s257_s3] sm:$0xff] %vm144_vm0, %v143_v62 }
  0xd7   :  { %150 = vsyncpa [#allocation4], 1 }
  0xd8   :  { %151 = vsyncpa [#allocation6], 1 }

</bundles_post_ra>
